<compile_context>
chip_gen: v7x
topology: tpu7x:2x2x1
jax: 0.10.0
libtpu: 0.0.40
codegen_flags: <defaults>
</compile_context>

<pallas_src>
import math
import functools

import jax
import jax.numpy as jnp
from jax.experimental import pallas as pl
from jax.experimental.pallas import tpu as pltpu

MASK_VALUE = -1000000.0


def _attn_kernel(x_ref, am_ref, vm_ref, wqkv_ref, bqkv_ref, wp_ref, bp_ref,
                 o_ref, qkv_ref, y_ref, *, n_head):
    # Per grid step (b, qi):
    #   x_ref:    (1, T, C)   full sequence of this batch element (compute dtype)
    #   am_ref:   (1, tq, T)  int8 attention-mask tile (0 -> masked)
    #   vm_ref:   (1, 1, T)   int8 valid-input mask over keys (0 -> masked)
    #   wqkv_ref: (C, 3C)     fused Q|K|V projection weight (compute dtype)
    #   bqkv_ref: (1, 3C)     fused Q|K|V bias (f32)
    #   wp_ref:   (C, C)      output projection weight (compute dtype)
    #   bp_ref:   (1, C)      output projection bias (f32)
    #   o_ref:    (1, tq, C)  output tile
    #   qkv_ref:  (T, 3C)     VMEM scratch: cached Q|K|V for this batch element
    #   y_ref:    (tq, C)     VMEM scratch: concatenated per-head attn outputs
    T = x_ref.shape[1]
    C = x_ref.shape[2]
    tq = o_ref.shape[1]
    H = n_head
    D = C // H
    scale = 1.0 / math.sqrt(D)
    qi = pl.program_id(1)

    # ---- Fused QKV projection, once per batch element, cached in VMEM. ----
    # Row-chunked so the f32 transient stays bounded to (tq, 3C).
    @pl.when(qi == 0)
    def _():
        for r in range(T // tq):
            xr = x_ref[0, r * tq:(r + 1) * tq, :]                       # (tq, C)
            qkv = jnp.dot(xr, wqkv_ref[...],
                          preferred_element_type=jnp.float32)
            qkv = qkv + bqkv_ref[...]
            qkv_ref[r * tq:(r + 1) * tq, :] = qkv.astype(qkv_ref.dtype)

    # Combined keep-mask for this (query-tile x all-keys) block, computed once
    # and shared by every head (hoisted out of the head loop).
    keep = jnp.logical_and(am_ref[0] != 0, vm_ref[0] != 0)              # (tq, T)

    row0 = pl.multiple_of(qi * tq, tq)

    for h in range(H):                                                  # static head loop
        q_h = qkv_ref[pl.ds(row0, tq), pl.ds(h * D, D)]                 # (tq, D)
        k_h = qkv_ref[:, pl.ds(C + h * D, D)]                           # (T, D)
        v_h = qkv_ref[:, pl.ds(2 * C + h * D, D)]                       # (T, D)

        # scores = q @ k^T (contract over D), f32 accumulation on the MXU.
        att = jax.lax.dot_general(q_h, k_h, (((1,), (1,)), ((), ())),
                                  preferred_element_type=jnp.float32) * scale
        # masked_fill semantics (identical to the PyTorch reference, including
        # fully-masked rows which become a uniform distribution).
        att = jnp.where(keep, att, MASK_VALUE)

        # softmax over the key axis (f32 on VPU; normalization on the EUP).
        att = att - jnp.max(att, axis=-1, keepdims=True)
        p = jnp.exp(att)
        p = p * pl.reciprocal(jnp.sum(p, axis=-1, keepdims=True), approx=True)

        y_ref[:, h * D:(h + 1) * D] = jnp.dot(
            p.astype(v_h.dtype), v_h, preferred_element_type=jnp.float32)

    # Fused output projection over the concatenated heads: one full-width matmul.
    y = y_ref[...].astype(wp_ref.dtype)
    out = jnp.dot(y, wp_ref[...], preferred_element_type=jnp.float32) + bp_ref[...]
    o_ref[0] = out.astype(o_ref.dtype)


def causal_self_attention(x, attn_mask, valid_input_mask, params, n_head,
                          compute_dtype=jnp.bfloat16):
    """Pallas wrapper. x: (B, T, C); attn_mask: (B, T, T); valid_input_mask: (B, T)."""
    B, T, C = x.shape
    assert C % n_head == 0

    if attn_mask is None:
        attn_mask = jnp.ones((B, T, T), jnp.float32)
    if valid_input_mask is None:
        valid_input_mask = jnp.ones((B, T), jnp.float32)

    # Query tile: 128 rows when possible (lane/MXU friendly), else a single tile.
    tq = 128 if T % 128 == 0 else T
    nq = T // tq

    # PyTorch nn.Linear: y = x @ W.T + b, W: (out, in). Fuse the three projections
    # into one (C, 3C) weight so the kernel does a single full-width MXU matmul.
    w_qkv = jnp.concatenate(
        [params["wq"].T, params["wk"].T, params["wv"].T], axis=1).astype(compute_dtype)
    b_qkv = jnp.concatenate(
        [params["bq"], params["bk"], params["bv"]]).reshape(1, 3 * C).astype(jnp.float32)
    w_p = params["wp"].T.astype(compute_dtype)                       # (C, C)
    b_p = params["bp"].reshape(1, C).astype(jnp.float32)

    x_c = x.astype(compute_dtype)
    # Masks travel as lane-dense int8: 4x less HBM traffic / VMEM than f32.
    am_i8 = (attn_mask != 0).astype(jnp.int8)                        # (B, T, T)
    vm_i8 = (valid_input_mask != 0).astype(jnp.int8).reshape(B, 1, T)

    grid_spec = pltpu.PrefetchScalarGridSpec(
        num_scalar_prefetch=0,
        grid=(B, nq),
        in_specs=[
            pl.BlockSpec((1, T, C), lambda b, q: (b, 0, 0)),         # x (full seq)
            pl.BlockSpec((1, tq, T), lambda b, q: (b, q, 0)),        # attn mask tile
            pl.BlockSpec((1, 1, T), lambda b, q: (b, 0, 0)),         # valid mask
            pl.BlockSpec((C, 3 * C), lambda b, q: (0, 0)),           # Wqkv
            pl.BlockSpec((1, 3 * C), lambda b, q: (0, 0)),           # bqkv
            pl.BlockSpec((C, C), lambda b, q: (0, 0)),               # Wp
            pl.BlockSpec((1, C), lambda b, q: (0, 0)),               # bp
        ],
        out_specs=pl.BlockSpec((1, tq, C), lambda b, q: (b, q, 0)),
        scratch_shapes=[
            pltpu.VMEM((T, 3 * C), compute_dtype),                   # cached Q|K|V
            pltpu.VMEM((tq, C), jnp.float32),                        # head-concat output
        ],
    )

    kernel = functools.partial(_attn_kernel, n_head=n_head)

    return pl.pallas_call(
        kernel,
        out_shape=jax.ShapeDtypeStruct((B, T, C), x.dtype),
        grid_spec=grid_spec,
        compiler_params=pltpu.CompilerParams(
            # Batch axis is independent ("parallel"); the query-tile axis reuses
            # the cached QKV scratch, so it must stay "arbitrary".
            dimension_semantics=("parallel", "arbitrary"),
            vmem_limit_bytes=48 * 1024 * 1024,
        ),
    )(x_c, am_i8, vm_i8, w_qkv, b_qkv, w_p, b_p)


def reference_attention(x, attn_mask, valid_input_mask, params, n_head):
    """Pure-JAX reference matching the PyTorch forward (eval mode)."""
    B, T, C = x.shape
    D = C // n_head
    lin = lambda x, W, b: x @ W.T + b
    k = lin(x, params["wk"], params["bk"]).reshape(B, T, n_head, D).transpose(0, 2, 1, 3)
    q = lin(x, params["wq"], params["bq"]).reshape(B, T, n_head, D).transpose(0, 2, 1, 3)
    v = lin(x, params["wv"], params["bv"]).reshape(B, T, n_head, D).transpose(0, 2, 1, 3)
    att = jnp.einsum("bhtd,bhsd->bhts", q, k) / math.sqrt(D)
    att = jnp.where(attn_mask[:, None, :, :] == 0, MASK_VALUE, att)
    att = jnp.where(valid_input_mask[:, None, None, :] == 0, MASK_VALUE, att)
    att = jax.nn.softmax(att, axis=-1)
    y = jnp.einsum("bhts,bhsd->bhtd", att, v)
    y = y.transpose(0, 2, 1, 3).reshape(B, T, C)
    return lin(y, params["wp"], params["bp"])


if __name__ == "__main__":
    B, T, C, n_head = 2, 8, 32, 4

    key = jax.random.PRNGKey(0)
    keys = jax.random.split(key, 10)
    s = 1.0 / math.sqrt(C)
    params = {
        "wq": jax.random.normal(keys[0], (C, C), jnp.float32) * s,
        "bq": jax.random.normal(keys[1], (C,), jnp.float32) * s,
        "wk": jax.random.normal(keys[2], (C, C), jnp.float32) * s,
        "bk": jax.random.normal(keys[3], (C,), jnp.float32) * s,
        "wv": jax.random.normal(keys[4], (C, C), jnp.float32) * s,
        "bv": jax.random.normal(keys[5], (C,), jnp.float32) * s,
        "wp": jax.random.normal(keys[6], (C, C), jnp.float32) * s,
        "bp": jax.random.normal(keys[7], (C,), jnp.float32) * s,
    }

    x = jax.random.normal(keys[8], (B, T, C), jnp.float32)

    # causal mask (B, T, T) and a valid-input mask (B, T) with some masked keys
    causal = jnp.tril(jnp.ones((T, T), jnp.float32))
    attn_mask = jnp.broadcast_to(causal, (B, T, T))
    valid_input_mask = jnp.ones((B, T), jnp.float32).at[1, T - 2:].set(0.0)

    ref = reference_attention(x, attn_mask, valid_input_mask, params, n_head)

    # 1) f32 compute path: tight correctness check (only approx-reciprocal noise).
    out_f32 = causal_self_attention(x, attn_mask, valid_input_mask, params, n_head,
                                    compute_dtype=jnp.float32)
    out_f32 = jax.block_until_ready(out_f32)
    assert out_f32.shape == (B, T, C)
    assert jnp.allclose(out_f32, ref, atol=5e-2, rtol=5e-2), \
        float(jnp.max(jnp.abs(out_f32 - ref)))

    # 2) default bf16 compute path (MXU-optimized): looser tolerance.
    out_bf16 = causal_self_attention(x, attn_mask, valid_input_mask, params, n_head)
    out_bf16 = jax.block_until_ready(out_bf16)
    assert out_bf16.shape == (B, T, C)
    assert jnp.allclose(out_bf16, ref, atol=1e-1, rtol=1e-1), \
        float(jnp.max(jnp.abs(out_bf16 - ref)))

    print("KERNEL_OK")
</pallas_src>

<mosaic_0001>
module attributes {stable_mosaic.version = 11 : i64} {
  func.func @_attn_kernel(%arg0: i32, %arg1: i32, %arg2: memref<1x8x32xf32, #tpu.memory_space<vmem>>, %arg3: memref<1x8x8xi8, #tpu.memory_space<vmem>>, %arg4: memref<1x1x8xi8, #tpu.memory_space<vmem>>, %arg5: memref<32x96xf32, #tpu.memory_space<vmem>>, %arg6: memref<1x96xf32, #tpu.memory_space<vmem>>, %arg7: memref<32x32xf32, #tpu.memory_space<vmem>>, %arg8: memref<1x32xf32, #tpu.memory_space<vmem>>, %arg9: memref<1x8x32xf32, #tpu.memory_space<vmem>>, %arg10: memref<8x96xf32, #tpu.memory_space<vmem>>, %arg11: memref<8x32xf32, #tpu.memory_space<vmem>>) attributes {dimension_semantics = [#tpu.dimension_semantics<parallel>, #tpu.dimension_semantics<arbitrary>], iteration_bounds = array<i64: 2, 1>, scalar_prefetch = 0 : i64, scratch_operands = 2 : i64, tpu.core_type = #tpu.core_type<tc>, window_params = [{transform_indices = @transform_0, window_bounds = array<i64: 1, 8, 32>}, {transform_indices = @transform_1, window_bounds = array<i64: 1, 8, 8>}, {transform_indices = @transform_2, window_bounds = array<i64: 1, 1, 8>}, {pipeline_mode = #tpu.pipeline_mode<synchronous>, transform_indices = @transform_3, window_bounds = array<i64: 32, 96>}, {pipeline_mode = #tpu.pipeline_mode<synchronous>, transform_indices = @transform_4, window_bounds = array<i64: 1, 96>}, {pipeline_mode = #tpu.pipeline_mode<synchronous>, transform_indices = @transform_5, window_bounds = array<i64: 32, 32>}, {pipeline_mode = #tpu.pipeline_mode<synchronous>, transform_indices = @transform_6, window_bounds = array<i64: 1, 32>}, {transform_indices = @transform_7, window_bounds = array<i64: 1, 8, 32>}]} {
    %c0_i32 = arith.constant 0 : i32
    %0 = arith.cmpi eq, %arg1, %c0_i32 : i32
    %1 = arith.extui %0 : i1 to i32
    %c0_i32_0 = arith.constant 0 : i32
    %2 = arith.cmpi ne, %1, %c0_i32_0 : i32
    scf.if %2 {
      %c0_57 = arith.constant 0 : index
      %c0_58 = arith.constant 0 : index
      %c0_59 = arith.constant 0 : index
      %108 = vector.load %arg2[%c0_57, %c0_58, %c0_59] : memref<1x8x32xf32, #tpu.memory_space<vmem>>, vector<1x8x32xf32>
      %109 = vector.shape_cast %108 : vector<1x8x32xf32> to vector<8x32xf32>
      %c0_60 = arith.constant 0 : index
      %c0_61 = arith.constant 0 : index
      %110 = vector.load %arg5[%c0_60, %c0_61] : memref<32x96xf32, #tpu.memory_space<vmem>>, vector<32x96xf32>
      %cst_62 = arith.constant dense<0.000000e+00> : vector<8x96xf32>
      %111 = tpu.matmul %109, %110, %cst_62 {dimension_numbers = #tpu.dot_dimension_numbers<[1], [0], [0], [1], [0, 0, 1, 1], [], []>} : vector<8x32xf32>, vector<32x96xf32>, vector<8x96xf32> -> vector<8x96xf32>
      %c0_63 = arith.constant 0 : index
      %c0_64 = arith.constant 0 : index
      %112 = vector.load %arg6[%c0_63, %c0_64] : memref<1x96xf32, #tpu.memory_space<vmem>>, vector<1x96xf32>
      %113 = vector.broadcast %112 : vector<1x96xf32> to vector<8x96xf32>
      %114 = arith.addf %111, %113 : vector<8x96xf32>
      %c0_65 = arith.constant 0 : index
      %c0_66 = arith.constant 0 : index
      %115 = vector.load %arg10[%c0_65, %c0_66] : memref<8x96xf32, #tpu.memory_space<vmem>>, vector<8x96xf32>
      tpu.vector_store %arg10[%c0_65, %c0_66], %114 {strides = array<i32>} : memref<8x96xf32, #tpu.memory_space<vmem>>, vector<8x96xf32>,
    } else {
    }
    %c0 = arith.constant 0 : index
    %c0_1 = arith.constant 0 : index
    %c0_2 = arith.constant 0 : index
    %3 = vector.load %arg3[%c0, %c0_1, %c0_2] : memref<1x8x8xi8, #tpu.memory_space<vmem>>, vector<1x8x8xi8>
    %4 = vector.shape_cast %3 : vector<1x8x8xi8> to vector<8x8xi8>
    %c0_i8 = arith.constant 0 : i8
    %5 = vector.broadcast %c0_i8 : i8 to vector<8x8xi8>
    %6 = arith.cmpi ne, %4, %5 : vector<8x8xi8>
    %c0_3 = arith.constant 0 : index
    %c0_4 = arith.constant 0 : index
    %c0_5 = arith.constant 0 : index
    %7 = vector.load %arg4[%c0_3, %c0_4, %c0_5] : memref<1x1x8xi8, #tpu.memory_space<vmem>>, vector<1x1x8xi8>
    %8 = vector.shape_cast %7 : vector<1x1x8xi8> to vector<1x8xi8>
    %c0_i8_6 = arith.constant 0 : i8
    %9 = vector.broadcast %c0_i8_6 : i8 to vector<1x8xi8>
    %10 = arith.cmpi ne, %8, %9 : vector<1x8xi8>
    %11 = vector.broadcast %10 : vector<1x8xi1> to vector<8x8xi1>
    %12 = arith.andi %6, %11 : vector<8x8xi1>
    %c8_i32 = arith.constant 8 : i32
    %13 = arith.muli %arg1, %c8_i32 : i32
    %14 = tpu.assume_multiple %13, 8 : i32
    %15 = arith.index_cast %14 : i32 to index
    %c0_7 = arith.constant 0 : index
    %16 = vector.load %arg10[%15, %c0_7] : memref<8x96xf32, #tpu.memory_space<vmem>>, vector<8x8xf32>
    %c0_8 = arith.constant 0 : index
    %c32 = arith.constant 32 : index
    %17 = vector.load %arg10[%c0_8, %c32] : memref<8x96xf32, #tpu.memory_space<vmem>>, vector<8x8xf32>
    %c0_9 = arith.constant 0 : index
    %c64 = arith.constant 64 : index
    %18 = vector.load %arg10[%c0_9, %c64] : memref<8x96xf32, #tpu.memory_space<vmem>>, vector<8x8xf32>
    %cst = arith.constant dense<0.000000e+00> : vector<8x8xf32>
    %19 = tpu.matmul %16, %17, %cst {dimension_numbers = #tpu.dot_dimension_numbers<[1], [1], [0], [0], [0, 0, 1, 0], [], []>} : vector<8x8xf32>, vector<8x8xf32>, vector<8x8xf32> -> vector<8x8xf32>
    %cst_10 = arith.constant 0.353553385 : f32
    %20 = vector.broadcast %cst_10 : f32 to vector<8x8xf32>
    %21 = arith.mulf %19, %20 : vector<8x8xf32>
    %cst_11 = arith.constant -1.000000e+06 : f32
    %22 = vector.broadcast %cst_11 : f32 to vector<8x8xf32>
    %23 = arith.select %12, %21, %22 : vector<8x8xi1>, vector<8x8xf32>
    %cst_12 = arith.constant dense<0xFF800000> : vector<8xf32>
    %24 = vector.multi_reduction <maximumf>, %23, %cst_12 [1] : vector<8x8xf32> to vector<8xf32>
    %25 = vector.shape_cast %24 : vector<8xf32> to vector<8x1xf32>
    %26 = vector.broadcast %25 : vector<8x1xf32> to vector<8x8xf32>
    %27 = arith.subf %23, %26 : vector<8x8xf32>
    %28 = math.exp %27 : vector<8x8xf32>
    %cst_13 = arith.constant dense<0.000000e+00> : vector<8xf32>
    %29 = vector.multi_reduction <add>, %28, %cst_13 [1] : vector<8x8xf32> to vector<8xf32>
    %30 = vector.shape_cast %29 : vector<8xf32> to vector<8x1xf32>
    %31 = tpu.reciprocal %30 {approx = true} : vector<8x1xf32> -> vector<8x1xf32>
    %32 = vector.broadcast %31 : vector<8x1xf32> to vector<8x8xf32>
    %33 = arith.mulf %28, %32 : vector<8x8xf32>
    %cst_14 = arith.constant dense<0.000000e+00> : vector<8x8xf32>
    %34 = tpu.matmul %33, %18, %cst_14 {dimension_numbers = #tpu.dot_dimension_numbers<[1], [0], [0], [1], [0, 0, 1, 1], [], []>} : vector<8x8xf32>, vector<8x8xf32>, vector<8x8xf32> -> vector<8x8xf32>
    %c0_15 = arith.constant 0 : index
    %c0_16 = arith.constant 0 : index
    %35 = vector.load %arg11[%c0_15, %c0_16] : memref<8x32xf32, #tpu.memory_space<vmem>>, vector<8x8xf32>
    tpu.vector_store %arg11[%c0_15, %c0_16], %34 {strides = array<i32>} : memref<8x32xf32, #tpu.memory_space<vmem>>, vector<8x8xf32>,
    %36 = arith.index_cast %14 : i32 to index
    %c8 = arith.constant 8 : index
    %37 = vector.load %arg10[%36, %c8] : memref<8x96xf32, #tpu.memory_space<vmem>>, vector<8x8xf32>
    %c0_17 = arith.constant 0 : index
    %c40 = arith.constant 40 : index
    %38 = vector.load %arg10[%c0_17, %c40] : memref<8x96xf32, #tpu.memory_space<vmem>>, vector<8x8xf32>
    %c0_18 = arith.constant 0 : index
    %c72 = arith.constant 72 : index
    %39 = vector.load %arg10[%c0_18, %c72] : memref<8x96xf32, #tpu.memory_space<vmem>>, vector<8x8xf32>
    %cst_19 = arith.constant dense<0.000000e+00> : vector<8x8xf32>
    %40 = tpu.matmul %37, %38, %cst_19 {dimension_numbers = #tpu.dot_dimension_numbers<[1], [1], [0], [0], [0, 0, 1, 0], [], []>} : vector<8x8xf32>, vector<8x8xf32>, vector<8x8xf32> -> vector<8x8xf32>
    %cst_20 = arith.constant 0.353553385 : f32
    %41 = vector.broadcast %cst_20 : f32 to vector<8x8xf32>
    %42 = arith.mulf %40, %41 : vector<8x8xf32>
    %cst_21 = arith.constant -1.000000e+06 : f32
    %43 = vector.broadcast %cst_21 : f32 to vector<8x8xf32>
    %44 = arith.select %12, %42, %43 : vector<8x8xi1>, vector<8x8xf32>
    %cst_22 = arith.constant dense<0xFF800000> : vector<8xf32>
    %45 = vector.multi_reduction <maximumf>, %44, %cst_22 [1] : vector<8x8xf32> to vector<8xf32>
    %46 = vector.shape_cast %45 : vector<8xf32> to vector<8x1xf32>
    %47 = vector.broadcast %46 : vector<8x1xf32> to vector<8x8xf32>
    %48 = arith.subf %44, %47 : vector<8x8xf32>
    %49 = math.exp %48 : vector<8x8xf32>
    %cst_23 = arith.constant dense<0.000000e+00> : vector<8xf32>
    %50 = vector.multi_reduction <add>, %49, %cst_23 [1] : vector<8x8xf32> to vector<8xf32>
    %51 = vector.shape_cast %50 : vector<8xf32> to vector<8x1xf32>
    %52 = tpu.reciprocal %51 {approx = true} : vector<8x1xf32> -> vector<8x1xf32>
    %53 = vector.broadcast %52 : vector<8x1xf32> to vector<8x8xf32>
    %54 = arith.mulf %49, %53 : vector<8x8xf32>
    %cst_24 = arith.constant dense<0.000000e+00> : vector<8x8xf32>
    %55 = tpu.matmul %54, %39, %cst_24 {dimension_numbers = #tpu.dot_dimension_numbers<[1], [0], [0], [1], [0, 0, 1, 1], [], []>} : vector<8x8xf32>, vector<8x8xf32>, vector<8x8xf32> -> vector<8x8xf32>
    %c0_25 = arith.constant 0 : index
    %c8_26 = arith.constant 8 : index
    %56 = vector.load %arg11[%c0_25, %c8_26] : memref<8x32xf32, #tpu.memory_space<vmem>>, vector<8x8xf32>
    tpu.vector_store %arg11[%c0_25, %c8_26], %55 {strides = array<i32>} : memref<8x32xf32, #tpu.memory_space<vmem>>, vector<8x8xf32>,
    %57 = arith.index_cast %14 : i32 to index
    %c16 = arith.constant 16 : index
    %58 = vector.load %arg10[%57, %c16] : memref<8x96xf32, #tpu.memory_space<vmem>>, vector<8x8xf32>
    %c0_27 = arith.constant 0 : index
    %c48 = arith.constant 48 : index
    %59 = vector.load %arg10[%c0_27, %c48] : memref<8x96xf32, #tpu.memory_space<vmem>>, vector<8x8xf32>
    %c0_28 = arith.constant 0 : index
    %c80 = arith.constant 80 : index
    %60 = vector.load %arg10[%c0_28, %c80] : memref<8x96xf32, #tpu.memory_space<vmem>>, vector<8x8xf32>
    %cst_29 = arith.constant dense<0.000000e+00> : vector<8x8xf32>
    %61 = tpu.matmul %58, %59, %cst_29 {dimension_numbers = #tpu.dot_dimension_numbers<[1], [1], [0], [0], [0, 0, 1, 0], [], []>} : vector<8x8xf32>, vector<8x8xf32>, vector<8x8xf32> -> vector<8x8xf32>
    %cst_30 = arith.constant 0.353553385 : f32
    %62 = vector.broadcast %cst_30 : f32 to vector<8x8xf32>
    %63 = arith.mulf %61, %62 : vector<8x8xf32>
    %cst_31 = arith.constant -1.000000e+06 : f32
    %64 = vector.broadcast %cst_31 : f32 to vector<8x8xf32>
    %65 = arith.select %12, %63, %64 : vector<8x8xi1>, vector<8x8xf32>
    %cst_32 = arith.constant dense<0xFF800000> : vector<8xf32>
    %66 = vector.multi_reduction <maximumf>, %65, %cst_32 [1] : vector<8x8xf32> to vector<8xf32>
    %67 = vector.shape_cast %66 : vector<8xf32> to vector<8x1xf32>
    %68 = vector.broadcast %67 : vector<8x1xf32> to vector<8x8xf32>
    %69 = arith.subf %65, %68 : vector<8x8xf32>
    %70 = math.exp %69 : vector<8x8xf32>
    %cst_33 = arith.constant dense<0.000000e+00> : vector<8xf32>
    %71 = vector.multi_reduction <add>, %70, %cst_33 [1] : vector<8x8xf32> to vector<8xf32>
    %72 = vector.shape_cast %71 : vector<8xf32> to vector<8x1xf32>
    %73 = tpu.reciprocal %72 {approx = true} : vector<8x1xf32> -> vector<8x1xf32>
    %74 = vector.broadcast %73 : vector<8x1xf32> to vector<8x8xf32>
    %75 = arith.mulf %70, %74 : vector<8x8xf32>
    %cst_34 = arith.constant dense<0.000000e+00> : vector<8x8xf32>
    %76 = tpu.matmul %75, %60, %cst_34 {dimension_numbers = #tpu.dot_dimension_numbers<[1], [0], [0], [1], [0, 0, 1, 1], [], []>} : vector<8x8xf32>, vector<8x8xf32>, vector<8x8xf32> -> vector<8x8xf32>
    %c0_35 = arith.constant 0 : index
    %c16_36 = arith.constant 16 : index
    %77 = vector.load %arg11[%c0_35, %c16_36] : memref<8x32xf32, #tpu.memory_space<vmem>>, vector<8x8xf32>
    tpu.vector_store %arg11[%c0_35, %c16_36], %76 {strides = array<i32>} : memref<8x32xf32, #tpu.memory_space<vmem>>, vector<8x8xf32>,
    %78 = arith.index_cast %14 : i32 to index
    %c24 = arith.constant 24 : index
    %79 = vector.load %arg10[%78, %c24] : memref<8x96xf32, #tpu.memory_space<vmem>>, vector<8x8xf32>
    %c0_37 = arith.constant 0 : index
    %c56 = arith.constant 56 : index
    %80 = vector.load %arg10[%c0_37, %c56] : memref<8x96xf32, #tpu.memory_space<vmem>>, vector<8x8xf32>
    %c0_38 = arith.constant 0 : index
    %c88 = arith.constant 88 : index
    %81 = vector.load %arg10[%c0_38, %c88] : memref<8x96xf32, #tpu.memory_space<vmem>>, vector<8x8xf32>
    %cst_39 = arith.constant dense<0.000000e+00> : vector<8x8xf32>
    %82 = tpu.matmul %79, %80, %cst_39 {dimension_numbers = #tpu.dot_dimension_numbers<[1], [1], [0], [0], [0, 0, 1, 0], [], []>} : vector<8x8xf32>, vector<8x8xf32>, vector<8x8xf32> -> vector<8x8xf32>
    %cst_40 = arith.constant 0.353553385 : f32
    %83 = vector.broadcast %cst_40 : f32 to vector<8x8xf32>
    %84 = arith.mulf %82, %83 : vector<8x8xf32>
    %cst_41 = arith.constant -1.000000e+06 : f32
    %85 = vector.broadcast %cst_41 : f32 to vector<8x8xf32>
    %86 = arith.select %12, %84, %85 : vector<8x8xi1>, vector<8x8xf32>
    %cst_42 = arith.constant dense<0xFF800000> : vector<8xf32>
    %87 = vector.multi_reduction <maximumf>, %86, %cst_42 [1] : vector<8x8xf32> to vector<8xf32>
    %88 = vector.shape_cast %87 : vector<8xf32> to vector<8x1xf32>
    %89 = vector.broadcast %88 : vector<8x1xf32> to vector<8x8xf32>
    %90 = arith.subf %86, %89 : vector<8x8xf32>
    %91 = math.exp %90 : vector<8x8xf32>
    %cst_43 = arith.constant dense<0.000000e+00> : vector<8xf32>
    %92 = vector.multi_reduction <add>, %91, %cst_43 [1] : vector<8x8xf32> to vector<8xf32>
    %93 = vector.shape_cast %92 : vector<8xf32> to vector<8x1xf32>
    %94 = tpu.reciprocal %93 {approx = true} : vector<8x1xf32> -> vector<8x1xf32>
    %95 = vector.broadcast %94 : vector<8x1xf32> to vector<8x8xf32>
    %96 = arith.mulf %91, %95 : vector<8x8xf32>
    %cst_44 = arith.constant dense<0.000000e+00> : vector<8x8xf32>
    %97 = tpu.matmul %96, %81, %cst_44 {dimension_numbers = #tpu.dot_dimension_numbers<[1], [0], [0], [1], [0, 0, 1, 1], [], []>} : vector<8x8xf32>, vector<8x8xf32>, vector<8x8xf32> -> vector<8x8xf32>
    %c0_45 = arith.constant 0 : index
    %c24_46 = arith.constant 24 : index
    %98 = vector.load %arg11[%c0_45, %c24_46] : memref<8x32xf32, #tpu.memory_space<vmem>>, vector<8x8xf32>
    tpu.vector_store %arg11[%c0_45, %c24_46], %97 {strides = array<i32>} : memref<8x32xf32, #tpu.memory_space<vmem>>, vector<8x8xf32>,
    %c0_47 = arith.constant 0 : index
    %c0_48 = arith.constant 0 : index
    %99 = vector.load %arg11[%c0_47, %c0_48] : memref<8x32xf32, #tpu.memory_space<vmem>>, vector<8x32xf32>
    %c0_49 = arith.constant 0 : index
    %c0_50 = arith.constant 0 : index
    %100 = vector.load %arg7[%c0_49, %c0_50] : memref<32x32xf32, #tpu.memory_space<vmem>>, vector<32x32xf32>
    %cst_51 = arith.constant dense<0.000000e+00> : vector<8x32xf32>
    %101 = tpu.matmul %99, %100, %cst_51 {dimension_numbers = #tpu.dot_dimension_numbers<[1], [0], [0], [1], [0, 0, 1, 1], [], []>} : vector<8x32xf32>, vector<32x32xf32>, vector<8x32xf32> -> vector<8x32xf32>
    %c0_52 = arith.constant 0 : index
    %c0_53 = arith.constant 0 : index
    %102 = vector.load %arg8[%c0_52, %c0_53] : memref<1x32xf32, #tpu.memory_space<vmem>>, vector<1x32xf32>
    %103 = vector.broadcast %102 : vector<1x32xf32> to vector<8x32xf32>
    %104 = arith.addf %101, %103 : vector<8x32xf32>
    %c0_54 = arith.constant 0 : index
    %c0_55 = arith.constant 0 : index
    %c0_56 = arith.constant 0 : index
    %105 = vector.load %arg9[%c0_54, %c0_55, %c0_56] : memref<1x8x32xf32, #tpu.memory_space<vmem>>, vector<1x8x32xf32>
    %106 = vector.shape_cast %105 : vector<1x8x32xf32> to vector<8x32xf32>
    %107 = vector.shape_cast %104 : vector<8x32xf32> to vector<1x8x32xf32>
    tpu.vector_store %arg9[%c0_54, %c0_55, %c0_56], %107 {strides = array<i32>} : memref<1x8x32xf32, #tpu.memory_space<vmem>>, vector<1x8x32xf32>,
    return
  }
  func.func @transform_0(%arg0: i32, %arg1: i32) -> (i32, i32, i32) {
    %c0_i32 = arith.constant 0 : i32
    %c0_i32_0 = arith.constant 0 : i32
    %c0_i32_1 = arith.constant 0 : i32
    return %arg0, %c0_i32, %c0_i32_0 : i32, i32, i32
  }
  func.func @transform_1(%arg0: i32, %arg1: i32) -> (i32, i32, i32) {
    %c0_i32 = arith.constant 0 : i32
    %c0_i32_0 = arith.constant 0 : i32
    return %arg0, %arg1, %c0_i32 : i32, i32, i32
  }
  func.func @transform_2(%arg0: i32, %arg1: i32) -> (i32, i32, i32) {
    %c0_i32 = arith.constant 0 : i32
    %c0_i32_0 = arith.constant 0 : i32
    %c0_i32_1 = arith.constant 0 : i32
    return %arg0, %c0_i32, %c0_i32_0 : i32, i32, i32
  }
  func.func @transform_3(%arg0: i32, %arg1: i32) -> (i32, i32) {
    %c0_i32 = arith.constant 0 : i32
    %c0_i32_0 = arith.constant 0 : i32
    %c0_i32_1 = arith.constant 0 : i32
    return %c0_i32, %c0_i32_0 : i32, i32
  }
  func.func @transform_4(%arg0: i32, %arg1: i32) -> (i32, i32) {
    %c0_i32 = arith.constant 0 : i32
    %c0_i32_0 = arith.constant 0 : i32
    %c0_i32_1 = arith.constant 0 : i32
    return %c0_i32, %c0_i32_0 : i32, i32
  }
  func.func @transform_5(%arg0: i32, %arg1: i32) -> (i32, i32) {
    %c0_i32 = arith.constant 0 : i32
    %c0_i32_0 = arith.constant 0 : i32
    %c0_i32_1 = arith.constant 0 : i32
    return %c0_i32, %c0_i32_0 : i32, i32
  }
  func.func @transform_6(%arg0: i32, %arg1: i32) -> (i32, i32) {
    %c0_i32 = arith.constant 0 : i32
    %c0_i32_0 = arith.constant 0 : i32
    %c0_i32_1 = arith.constant 0 : i32
    return %c0_i32, %c0_i32_0 : i32, i32
  }
  func.func @transform_7(%arg0: i32, %arg1: i32) -> (i32, i32, i32) {
    %c0_i32 = arith.constant 0 : i32
    %c0_i32_0 = arith.constant 0 : i32
    return %arg0, %arg1, %c0_i32 : i32, i32, i32
  }
}

</mosaic_0001>

<bundles_post_ra>
// kernel: tpu_custom_call.1
= control target key start
LH: loop header
LB: loop body
LE: loop exit
PB: predicated region body
PF: predicated region fallthrough
CT: control target
= control target key end

     0   :  { %12 = vsyncpa [#allocation5], 0  ;;  %s2269_s0 = inlined_call_operand.hbm [shape: f32[2,8,32], index: 0, kind: input, shape index: {}]   ;;  %s2270_s1 = inlined_call_operand.vmem [shape: s8[2,8,8], index: 1, kind: input, shape index: {}]   ;;  %s2271_s2 = inlined_call_operand.vmem [shape: s8[2,1,8], index: 2, kind: input, shape index: {}]   ;;  %s2272_s3 = inlined_call_operand.hbm [shape: f32[32,96], index: 3, kind: input, shape index: {}]   ;;  %s2273_s4 = inlined_call_operand.vmem [shape: f32[1,96], index: 4, kind: input, shape index: {}]   ;;  %s2274_s5 = inlined_call_operand.hbm [shape: f32[32,32], index: 5, kind: input, shape index: {}]   ;;  %s2275_s6 = inlined_call_operand.vmem [shape: f32[1,32], index: 6, kind: input, shape index: {}]   ;;  %s2276_s7 = inlined_call_operand.hbm [shape: f32[2,8,32], index: 7, kind: output, shape index: {}]  }
   0x1   :  { %14 = vsyncpa [#allocation5 + $0x1], 0 }
   0x2   :  { %15 = vsyncpa [#allocation8], 0 }
   0x3   :  { %16 = vsyncpa [#allocation6], 0 }
   0x4   :  { %18 = vsyncpa [#allocation6 + $0x1], 0  ;;  %s1913_s24 = smov 0   ;;  %s1915_s25 = smov 0  }
   0x5   :  { %s1917_s26 = smov 0   ;;  %s1919_s27 = smov 0  }
   0x6   :  { %s1921_s28 = smov 0   ;;  %s1923_s29 = smov 0  }
   0x7 LB: > { %2283 = sst [smem:[#allocation14_spill]] %s1827_s24  ;;  %s1422_s30 = sadd.s32 4294967295, %s1847_s29   ;;  %s1847_s29 = sphi %s1923_s29, %s24_s29   ;;  %s1843_s28 = sphi %s1921_s28, %s2306_s28   ;;  %s1839_s27 = sphi %s1919_s27, %s2305_s27   ;;  %s1835_s26 = sphi %s1917_s26, %s2304_s26   ;;  %s1831_s25 = sphi %s1915_s25, %s2303_s25   ;;  %s1827_s24 = sphi %s1913_s24, %s2302_s24  }
   0x8   : > { %s1423_s8 = sadd.s32 4294967294, %s1847_s29   ;;  %p56_p0 = scmp.ne.s32.totalorder %s1831_s25, %s1827_s24 }
   0x9   : > { %p1947_p1 = scmp.eq.s32.totalorder %s1422_s30, 0  ;;  %p1951_p2 = scmp.eq.s32.totalorder %s1422_s30, 1 }
   0xa   : > { %p226_p3 = scmp.eq.s32.totalorder %s1423_s8, 1  ;;  %p1424_p5 = scmp.ge.s32.totalorder %s1847_s29, 1 }
   0xb   : > { %s2284_s9 = scalar_select %p1947_p1, 1, 0 }
   0xc   : > { %p1957_p4 = por %p1947_p1, %p56_p0  ;;  %p1962_p6 = por %p226_p3, %p56_p0 }
   0xd   : > { %p233_p7 = scmp.lt.s32.totalorder %s1847_s29, 3  ;;  %s1849_s14 = smov [#allocation7]  }
   0xe   : > { %s2286_s11 = scalar_select %p1957_p4, 1, 0 }
   0xf   : > { %s2287_s12 = scalar_select %p1962_p6, 1, 0 }
  0x10   : > { %p1967_p8 = pnand %p1424_p5, %p233_p7  ;;  %s245_s15 = sshll.u32 %s1849_s14, 4  ;;  %s1971_s15 = int_to_ptr.vmem [resolvable:$true] %s245_s15 }
  0x11   : > { %2288 = sst [smem:[#allocation15_spill]] %s2287_s12  ;;  %s1850_s17 = smov [#allocation9]  }
  0x12   : > { %p1568_p9 = pneg %p1967_p8  ;;  %s261_s18 = sshll.u32 %s1850_s17, 4  ;;  %s1982_s18 = int_to_ptr.vmem [resolvable:$true] %s261_s18 }
  0x13   : > { %s1675_s21 = scalar_lea.hbm %s2272_s3, 512 }
  0x14   : > { %p1978_p11 = pnand %p1568_p9, %p1947_p1  ;;  %p1676_p12 = scmp.ne.s32.totalorder %s2272_s3, %s1675_s21 }
  0x15   : > { %p1682_p5 = scmp.lt.u32.totalorder %s1675_s21, %s2272_s3 }
  0x16   : > { %p1677_p13 = pneg %p1978_p11 }
  0x18   : > { %p1678_p0 = pnand %p1677_p13, %p1676_p12 }
  0x1a   : > { %p1679_p3 = pneg %p1678_p0 }
  0x1c   : > { %p1684_p7 = pnand %p1682_p5, %p1679_p3 }
  0x1e   : > { %1687 = shalt.err (!%p1684_p7)
}
  0x1f   : > { %s1688_s14 = scalar_lea.vmem %s1971_s15, 512  ;;  %p1696_p1 = scmp.lt.s32.totalorder %s1971_s15, %s1971_s15 }
  0x20   : > { %p1689_p9 = scmp.ne.s32.totalorder %s1971_s15, %s1688_s14  ;;  %p1697_p12 = scmp.lt.s32.totalorder %s1688_s14, %s1688_s14 }
  0x22   : > { %p1691_p10 = pnand %p1689_p9, %p1677_p13  ;;  %p1698_p0 = por %p1697_p12, %p1696_p1 }
  0x24   : > { %p1692_p6 = pneg %p1691_p10 }
  0x26   : > { %p1699_p4 = pnand %p1698_p0, %p1692_p6 }
  0x28   : > { %1702 = shalt.err (!%p1699_p4)
}
  0x29   : > { %s1851_s17 = smov 128   ;;  %s1852_s19 = smov 8  }
  0x2a   : > { %1571 = dma.hbm_to_vmem [thread:$0]  (!%p1978_p11), %s2272_s3, 512, %s1971_s15, [#allocation8], %s1851_s17, %s1851_s17, %s1852_s19  }
  0x2b   : > { %s1703_s30 = scalar_lea.hbm %s2274_s5, 512 }
  0x2c   : > { %p1704_p1 = scmp.ne.s32.totalorder %s2274_s5, %s1703_s30  ;;  %p1710_p10 = scmp.lt.u32.totalorder %s1703_s30, %s2274_s5 }
  0x2e   : > { %p1706_p4 = pnand %p1704_p1, %p1677_p13 }
  0x30   : > { %p1707_p6 = pneg %p1706_p4 }
  0x32   : > { %p1712_p3 = pnand %p1710_p10, %p1707_p6 }
  0x34   : > { %1715 = shalt.err (!%p1712_p3)
}
  0x35   : > { %s1716_s15 = scalar_lea.vmem %s1982_s18, 512  ;;  %p1724_p12 = scmp.lt.s32.totalorder %s1982_s18, %s1982_s18 }
  0x36   : > { %p1717_p5 = scmp.ne.s32.totalorder %s1982_s18, %s1716_s15  ;;  %p1725_p0 = scmp.lt.s32.totalorder %s1716_s15, %s1716_s15 }
  0x38   : > { %p1719_p7 = pnand %p1717_p5, %p1677_p13  ;;  %p1726_p1 = por %p1725_p0, %p1724_p12 }
  0x3a   : > { %p1720_p9 = pneg %p1719_p7 }
  0x3c   : > { %p1727_p4 = pnand %p1726_p1, %p1720_p9 }
  0x3e   : > { %1730 = shalt.err (!%p1727_p4)
}
  0x3f   : > { %1574 = dma.hbm_to_vmem [thread:$0]  (!%p1978_p11), %s2274_s5, 512, %s1982_s18, [#allocation8], %s1851_s17, %s1851_s17, %s1852_s19  }
  0x40   : > { %s36_s20 = sadd.s32 1, %s1843_s28  ;;  %s43_s21 = sadd.s32 1, %s1835_s26 }
  0x41   : > { %p38_p13 = scmp.ge.s32.totalorder %s36_s20, 2  ;;  %p50_p6 = scmp.ne.s32.totalorder %s1835_s26, %s1831_s25 }
  0x42   : > { %p51_p10 = scmp.eq.s32.totalorder %s1847_s29, 0  ;;  %p1585_p3 = scmp.lt.s32.totalorder %s1847_s29, 2 }
  0x43   : > { %s2308_s20 = smov (%p38_p13, %s36_s20), 0  ;;  %p2046_p7 = por %p1951_p2, %p50_p6 }
  0x44   : > { %p52_p5 = por %p51_p10, %p50_p6  ;;  %s40_s22 = ssub.s32 %s1843_s28, %s2308_s20 }
  0x45   : > { %s2291_s16 = scalar_select %p2046_p7, 1, 0 }
  0x46   : > { %s278_s23 = sand.u32 1, %s1835_s26   ;;  %p41_p9 = scmp.eq.s32.totalorder %s40_s22, 0 }
  0x47   : > { %s1428_s18 = sshll.u32 %s278_s23, 3  ;;  %s1429_s17 = sshll.u32 %s1843_s28, 7 }
  0x48   : > { %s2055_s19 = scalar_select %p41_p9, %s1835_s26, %s43_s21  }
  0x49   : > { %s2060_s14 = scalar_lea.hbm %s2269_s0, %s1429_s17  ;;  %s282_s10 = scalar_lea.vmem [#allocation4], %s1428_s18 }
  0x4a   : > { %s289_s15 = sshll.u32 %s282_s10, 4  ;;  %p2064_p2 = pnand %p1585_p3, %p52_p5  ;;  %s2068_s15 = int_to_ptr.vmem [resolvable:$true] %s289_s15 }
  0x4b   : > { %s279_s12 = scalar_lea.sflag [#allocation5], %s278_s23  ;;  %s1731_s21 = scalar_lea.hbm %s2060_s14, 128 }
  0x4c   : > { %p1732_p11 = scmp.ne.s32.totalorder %s2060_s14, %s1731_s21  ;;  %p1733_p12 = pneg %p2064_p2 }
  0x4d   : > { %s1736_s17 = scalar_lea.hbm %s2269_s0, 256  ;;  %p1737_p4 = scmp.lt.u32.totalorder %s2060_s14, %s2269_s0 }
  0x4e   : > { %p1734_p0 = pnand %p1733_p12, %p1732_p11  ;;  %p1738_p13 = scmp.lt.u32.totalorder %s1736_s17, %s1731_s21 }
  0x4f   : > { %p1740_p10 = scmp.lt.u32.totalorder %s1731_s21, %s2060_s14 }
  0x50   : > { %p1735_p1 = pneg %p1734_p0  ;;  %p1739_p6 = por %p1738_p13, %p1737_p4 }
  0x52   : > { %p1741_p3 = por %p1740_p10, %p1739_p6 }
  0x54   : > { %p1742_p5 = pnand %p1741_p3, %p1735_p1 }
  0x56   : > { %1745 = shalt.err (!%p1742_p5)
}
  0x57   : > { %s1746_s23 = scalar_lea.vmem %s2068_s15, 128  ;;  %s1853_s10 = smov [#allocation4]  }
  0x58   : > { %p1747_p9 = scmp.ne.s32.totalorder %s2068_s15, %s1746_s23  ;;  %s1751_s22 = sshll.u32 %s1853_s10, 4  ;;  %s1752_s22 = int_to_ptr.vmem [resolvable:$false] %s1751_s22 }
  0x59   : > { %s1753_s18 = scalar_lea.vmem %s1752_s22, 256  ;;  %p1754_p7 = scmp.lt.s32.totalorder %s2068_s15, %s1752_s22 }
  0x5a   : > { %p1749_p11 = pnand %p1747_p9, %p1733_p12  ;;  %p1755_p4 = scmp.lt.s32.totalorder %s1753_s18, %s1746_s23 }
  0x5c   : > { %p1750_p0 = pneg %p1749_p11  ;;  %p1756_p13 = por %p1755_p4, %p1754_p7 }
  0x5e   : > { %p1757_p6 = pnand %p1756_p13, %p1750_p0 }
  0x60   : > { %1760 = shalt.err (!%p1757_p6)
}
  0x61   : > { %1578 = dma.hbm_to_vmem [thread:$0]  (!%p2064_p2), %s2060_s14, 128, %s2068_s15, %s279_s12  }
  0x62   : > { %314 = sbr.rel (%p1967_p8) target bundleno = 2133 (0x855), region = 48  ;;  %s2098_s21 = sand.u32 (!%p1967_p8), 1, %s1831_s25  }
  0x63   : > { %s1431_s17 = sshll.u32 (!%p1967_p8), %s2098_s21, 3  ;;  %s317_s30 = scalar_lea.sflag (!%p1967_p8), [#allocation5], %s2098_s21 }
  0x64   : > { %s320_s8 = scalar_lea.vmem (!%p1967_p8), [#allocation4], %s1431_s17  ;;  %p2293_p7 = scmp.ne.s32.totalorder (!%p1967_p8), %s2286_s11, 0 }
  0x69   : > { %1814 = dma.done.wait (%p2293_p7), %s317_s30, 128  }
  0x6a   : > { %1816 = vsyncadd (%p2293_p7), %s317_s30, 4294967168  ;;  %p2294_p2 = scmp.ne.s32.totalorder %s2284_s9, 0 }
  0x6c   : > { %1818 = dma.done.wait (%p2294_p2), [#allocation8], 1024  }
  0x6d   : > { %1820 = vsyncadd (%p2294_p2), [#allocation8], 4294966272  ;;  %v1854_v0 = vmov 0.0|0.0   ;;  %vm1855_vm0 = vmmov 0   ;;  %v1856_v1 = vmov 0.0   ;;  %v386_v2 = vld [vmem:[#allocation7] sm:$0xff]  ;;  %v481_v22 = vlaneseq }
  0x6e   : > { %1544 = vmatprep.subr.bf16.mxu0 %v1854_v0  ;;  %1490 = vmatprep.mubr.msk.f32.mxu0 %vm1855_vm0, %v1856_v1  ;;  %v387_v3 = vld [vmem:[#allocation7 + $0x8] sm:$0xff]  ;;  %v388_v4 = vld [vmem:[#allocation7 + $0x10] sm:$0xff]  ;;  %v389_v6 = vld [vmem:[#allocation7 + $0x18] sm:$0xff]  ;;  %vm397_vm1 = vcmask 261120   ;;  %vm471_vm2 = vcmask 785408   ;;  %s1857_s13 = smov 64  }
  0x6f   : > { %1493 = vmatprep.subr.mxu1 %v1856_v1  ;;  %1495 = vmatprep.mubr.msk.f32.mxu1 %vm1855_vm0, %v1856_v1  ;;  %v1545_v5 = vpack.c.bf16 %v387_v3, %v386_v2  ;;  %v1548_v7 = vpack.c.bf16 %v389_v6, %v388_v4  ;;  %v385_v8 = vld [vmem:[%s320_s8] sm:$0xff]  ;;  %v1436_v9 = vld [vmem:[%s2273_s4] ss:$0 sm:$0xff]  ;;  %s1858_s14 = smov 96   ;;  %s1859_s15 = smov 88   ;;  %vm496_vm3 = vcmask 64512  }
  0x70   : > { %s1860_s24 = smov 120   ;;  %s1861_s12 = smov 80   ;;  %v1862_v20 = vmov 0   ;;  %v482_v24 = vshrl.u32 %v481_v22, 7  ;;  %vm840_vm12 = vcmask 130112   ;;  %vm1017_vm13 = vcmask 195712  }
  0x71   : > { %1546 = vmatpush3.bf16.msra.mxu0 %v1545_v5  ;;  %p369_p8 = scmp.lt.s32.totalorder %s1839_s27, 1  ;;  %s1869_s10 = smov 8   ;;  %vm1194_vm14 = vcmask 261312  }
  0x72   : > { %1547 = vmatprep.subr.bf16.mxu0 %v1854_v0  ;;  %v483_v25 = vsub.s32 0, %v482_v24  ;;  %s1870_s22 = smov 16   ;;  %s1453_s9 = sshll.u32 %s1839_s27, 7 }
  0x73   : > { %s370_s23 = scalar_select %p369_p8, %s1839_s27, 1 }
  0x74   : > { %p2297_p1 = scmp.ne.s32.totalorder %s2291_s16, 0 }
  0x75   : > { %1549 = vmatpush3.bf16.msra.mxu0 %v1548_v7  ;;  %s378_s18 = scalar_lea.vmem %s2271_s2, %s370_s23  ;;  %s1435_s30 = sshll.u32 %s370_s23, 1 }
  0x76   : > { %1513 = vmatprep.subr.mxu0 %v1856_v1  ;;  %v475_v19 = vld [vmem:[%s378_s18] sm:$0x1]  ;;  %s375_s11 = scalar_lea.vmem %s2270_s1, %s1435_s30  ;;  %s1868_s23 = smov 40  }
  0x77   : > { %vm476_vm4 = vnez %v475_v19  ;;  %v473_v28 = vld [vmem:[%s375_s11] sm:$0x3]  ;;  %s1871_s18 = smov 24   ;;  %s368_s11 = scalar_lea.vmem [#allocation10], %s1431_s17 }
  0x78   : > { %1491 = vmatmul.mubr.msk.f32.vlgmr.msra.gmra.mrb[0].mxu0 %vm397_vm1, %v385_v8  ;;  %v477_v21 = vsel %vm476_vm4, 16843009, %v1862_v20  ;;  %vm474_vm8 = vnez %v473_v28  ;;  %s1872_s17 = smov [#allocation10]  }
  0x79   : > { %1515 = vmatprep.mubr.msk.f32.mxu0 %vm1855_vm0, %v1856_v1  ;;  %v478_v23 = vunpack.c.0.s8 %v477_v21 }
  0x7b   : > { %vm479_vm5 = vcmp.ne.s32.totalorder %v478_v23, 0 }
  0x7c   : > { %v480_v26 = vsel %vm479_vm5, 1, %v1862_v20 }
  0x7d   : > { %v484_v27 = vrot.slane %v480_v26, %v483_v25 }
  0x7f   : > { %vm485_vm6 = vcmp.eq.s32.totalorder %v484_v27, 1 }
  0x80   : > { %vm486_vm7 = vmpackc.low %vm485_vm6, %vm485_vm6 }
  0x81   : > { %vm487_vm9 = vmpackc.even %vm486_vm7, %vm486_vm7 }
  0x82   : > { %vm488_vm10 = vmand %vm474_vm8, %vm487_vm9 }
  0x83   : > { %v573_v29 = vsel %vm488_vm10, 16843009, %v1862_v20 }
  0x84   : > { %v574_v30 = vunpack.c.0.s8 %v573_v29 }
  0x86   : > { %vm2154_vm11 = vcmp.ne.s32.totalorder %v574_v30, 0  ;;  %v1197_v30 = vld [vmem:[#allocation9] sm:$0xff] }
 0x14b   : > { %v467_v10 = vpop.f32.mrb[0].mxu0 }
 0x14c   : > { %v468_v11 = vadd.f32 %v1436_v9, %v467_v10  ;;  %v1492_v12 = vpop.f32.mrb[1].mxu0 }
 0x14e   : > { %472 = vst.msk [vmem:[#allocation2] sm:$0xff] %vm471_vm2, %v468_v11 }
 0x155   : > { %v2126_v13 = vld [vmem:[#allocation2] sm:$0xff] }
 0x156   : > { %588 = vrot.lane.b32.xlu1 %v2126_v13, %s1857_s13  ;;  %494 = vrot.lane.b32.xlu0 %v2126_v13, %s1858_s14  ;;  %s1863_s13 = smov 72   ;;  %s1864_s14 = smov 112  }
 0x15a   : > { %671 = vrot.lane.b32.xlu1 %v2126_v13, %s1859_s15  ;;  %s1865_s15 = smov 104  }
 0x15e   : > { %668 = vrot.lane.b32.xlu1 %v2126_v13, %s1860_s24  ;;  %s1866_s24 = smov 56  }
 0x162   : > { %848 = vrot.lane.b32.xlu1 %v2126_v13, %s1861_s12  ;;  %s1867_s12 = smov 48  }
 0x1c8   : > { %v589_v14 = vpop.permute.xlu1 %588  ;;  %v495_v15 = vpop.permute.xlu0 %494 }
 0x1c9   : > { %1494 = vmatpush3.xpose.msk.msra.mxu1 %vm496_vm3, %v495_v15 }
 0x1ca   : > { %1498 = vmatprep.subr.mxu1 %v1856_v1 }
 0x1cc   : > { %v2135_v16 = vpop.permute.xlu1 %671  ;;  %1496 = vmatmul.mubr.msk.f32.vlgmr.msra.gmra.mrb[0].mxu1 %vm496_vm3, %v2126_v13 }
 0x1cd   : > { %1499 = vmatpush3.msra.mxu1 %v589_v14  ;;  %1500 = vmatprep.mubr.msk.f32.mxu1 %vm1855_vm0, %v1856_v1 }
 0x1ce   : > { %1503 = vmatprep.subr.mxu1 %v1856_v1 }
 0x1d0   : > { %v2142_v17 = vpop.permute.xlu1 %668 }
 0x1d4   : > { %v849_v18 = vpop.permute.xlu1 %848 }
 0x1d5   : > { %1514 = vmatpush3.xpose.msk.msra.mxu0 %vm496_vm3, %v849_v18 }
 0x1d6   : > { %1523 = vmatprep.subr.mxu0 %v1856_v1 }
 0x29f   : > { %v568_v31 = vpop.f32.mrb[0].mxu1 }
 0x2a0   : > { %v572_v33 = vmul.f32 0.35355338, %v568_v31  ;;  %v1497_v34 = vpop.f32.mrb[1].mxu1  ;;  %v1198_v31 = vld [vmem:[#allocation9 + $0x8] sm:$0xff] }
 0x2a1   : > { %v1551_v32 = vpack.c.bf16 %v1198_v31, %v1197_v30  ;;  %v1200_v34 = vld [vmem:[#allocation9 + $0x18] sm:$0xff] }
 0x2a2   : > { %v576_v35 = vsel %vm2154_vm11, %v572_v33, -1000000.0  ;;  %v1199_v33 = vld [vmem:[#allocation9 + $0x10] sm:$0xff] }
 0x2a3   : > { %v577_v36 = vsel %vm496_vm3, %v576_v35, -inf }
 0x2a4   : > { %578 = vmax.xlane.f32.xlu0 %v577_v36 }
 0x2ba   : > { %1025 = vrot.lane.b32.xlu0 %v2126_v13, %s1863_s13  ;;  %s1298_s13 = sshll.u32 %s368_s11, 4  ;;  %s2221_s13 = int_to_ptr.vmem [resolvable:$true] %s1298_s13 }
 0x2bb   : > { %s1761_s27 = scalar_lea.vmem %s2221_s13, 128 }
 0x2bc   : > { %p1762_p12 = scmp.ne.s32.totalorder %s2221_s13, %s1761_s27 }
 0x2be   : > { %p1763_p10 = pnand %p1762_p12, %p2297_p1 }
 0x2c0   : > { %p1764_p3 = pneg %p1763_p10 }
 0x331   : > { %v579_v37 = vpop.xlane.xlu0 %578 }
 0x332   : > { %v580_v38 = vsub.f32 %v576_v35, %v579_v37  ;;  %v1554_v35 = vpack.c.bf16 %v1200_v34, %v1199_v33 }
 0x334   : > { %v581_v39 = vmul.f32 1.442695, %v580_v38 }
 0x335   : > { %v1026_v44 = vpop.permute.xlu0 %1025 }
 0x336   : > { %1659 = vpow2.f32 %v581_v39 }
 0x340   : > { %v1660_v40 = vpop.eup %1659 }
 0x341   : > { %v583_v41 = vsel %vm496_vm3, %v1660_v40, 0.0 }
 0x342   : > { %584 = vadd.xlane.f32.xlu1 %v583_v41 }
 0x353   : > { %845 = vrot.lane.b32.xlu1 %v2126_v13, %s1864_s14 }
 0x357   : > { %1022 = vrot.lane.b32.xlu1 %v2126_v13, %s1865_s15 }
 0x3cf   : > { %v585_v42 = vpop.xlane.xlu1 %584 }
 0x3d0   : > { %1661 = vrcp.f32 %v585_v42 }
 0x3d3   : > { %v846_v43 = vpop.permute.xlu1 %845 }
 0x3d4   : > { %1516 = vmatmul.mubr.msk.f32.vlgmr.msra.gmra.mrb[2].mxu0 %vm496_vm3, %v846_v43 }
 0x3d5   : > { %1524 = vmatpush3.xpose.msk.msra.mxu0 %vm496_vm3, %v1026_v44  ;;  %1525 = vmatprep.mubr.msk.f32.mxu0 %vm1855_vm0, %v1856_v1  ;;  %v1450_v44 = vld [vmem:[%s2275_s6] ss:$0 sm:$0xff] }
 0x3d6   : > { %1550 = vmatprep.subr.bf16.mxu0 %v1854_v0 }
 0x3d7   : > { %v1023_v45 = vpop.permute.xlu1 %1022 }
 0x3d8   : > { %1526 = vmatmul.mubr.msk.f32.vlgmr.msra.gmra.mrb[4].mxu0 %vm496_vm3, %v1023_v45 }
 0x3d9   : > { %1541 = vmatprep.mubr.msk.f32.mxu0 %vm1855_vm0, %v1856_v1  ;;  %1552 = vmatpush3.bf16.msra.mxu0 %v1551_v32 }
 0x3da   : > { %v1662_v46 = vpop.eup %1661  ;;  %1553 = vmatprep.subr.bf16.mxu0 %v1854_v0 }
 0x3db   : > { %v587_v47 = vmul.f32 %v1662_v46, %v1660_v40 }
 0x3dd   : > { %1501 = vmatmul.mubr.msk.f32.vlgmr.msra.gmra.mrb[2].mxu1 %vm496_vm3, %v587_v47  ;;  %1555 = vmatpush3.bf16.msra.mxu0 %v1554_v35 }
 0x3de   : > { %1504 = vmatpush3.xpose.msk.msra.mxu1 %vm496_vm3, %v2135_v16  ;;  %1505 = vmatprep.mubr.msk.f32.mxu1 %vm1855_vm0, %v1856_v1 }
 0x3df   : > { %1508 = vmatprep.subr.mxu1 %v1856_v1 }
 0x3e1   : > { %1506 = vmatmul.mubr.msk.f32.vlgmr.msra.gmra.mrb[4].mxu1 %vm496_vm3, %v2142_v17 }
 0x3e2   : > { %1510 = vmatprep.mubr.msk.f32.mxu1 %vm1855_vm0, %v1856_v1 }
 0x4a7   : > { %v920_v48 = vpop.f32.mrb[2].mxu0 }
 0x4a8   : > { %v924_v49 = vmul.f32 0.35355338, %v920_v48  ;;  %v1517_v50 = vpop.f32.mrb[3].mxu0 }
 0x4aa   : > { %v925_v51 = vsel %vm2154_vm11, %v924_v49, -1000000.0 }
 0x4ab   : > { %v1097_v52 = vpop.f32.mrb[4].mxu0  ;;  %v926_v53 = vsel %vm496_vm3, %v925_v51, -inf }
 0x4ac   : > { %927 = vmax.xlane.f32.xlu0 %v926_v53  ;;  %v1527_v54 = vpop.f32.mrb[5].mxu0  ;;  %v1101_v58 = vmul.f32 0.35355338, %v1097_v52 }
 0x4ae   : > { %v1102_v63 = vsel %vm2154_vm11, %v1101_v58, -1000000.0 }
 0x4af   : > { %v1103_v2 = vsel %vm496_vm3, %v1102_v63, -inf }
 0x4b0   : > { %v660_v55 = vpop.f32.mrb[2].mxu1 }
 0x4b1   : > { %664 = vst.msk [vmem:[#allocation3] sm:$0xff] %vm496_vm3, %v660_v55  ;;  %v1502_v56 = vpop.f32.mrb[3].mxu1 }
 0x4b4   : > { %v743_v57 = vpop.f32.mrb[4].mxu1 }
 0x4b5   : > { %v747_v59 = vmul.f32 0.35355338, %v743_v57  ;;  %v1507_v60 = vpop.f32.mrb[5].mxu1 }
 0x4b7   : > { %v748_v61 = vsel %vm2154_vm11, %v747_v59, -1000000.0 }
 0x4b8   : > { %v749_v62 = vsel %vm496_vm3, %v748_v61, -inf }
 0x4b9   : > { %750 = vmax.xlane.f32.xlu1 %v749_v62 }
 0x4bd   : > { %1104 = vmax.xlane.f32.xlu1 %v1103_v2 }
 0x539   : > { %v928_v3 = vpop.xlane.xlu0 %927 }
 0x53a   : > { %v929_v4 = vsub.f32 %v925_v51, %v928_v3 }
 0x53c   : > { %v930_v5 = vmul.f32 1.442695, %v929_v4 }
 0x53e   : > { %1663 = vpow2.f32 %v930_v5 }
 0x546   : > { %v751_v6 = vpop.xlane.xlu1 %750 }
 0x547   : > { %v752_v15 = vsub.f32 %v748_v61, %v751_v6 }
 0x548   : > { %v1664_v7 = vpop.eup %1663 }
 0x549   : > { %v932_v8 = vsel %vm496_vm3, %v1664_v7, 0.0  ;;  %v753_v16 = vmul.f32 1.442695, %v752_v15 }
 0x54a   : > { %933 = vadd.xlane.f32.xlu1 %v932_v8  ;;  %v1105_v9 = vpop.xlane.xlu1 %1104 }
 0x54b   : > { %v1106_v10 = vsub.f32 %v1102_v63, %v1105_v9 }
 0x54d   : > { %v1107_v11 = vmul.f32 1.442695, %v1106_v10 }
 0x54f   : > { %1665 = vpow2.f32 %v1107_v11 }
 0x550   : > { %1667 = vpow2.f32 %v753_v16 }
 0x559   : > { %v1666_v12 = vpop.eup %1665 }
 0x55a   : > { %v1109_v14 = vsel %vm496_vm3, %v1666_v12, 0.0  ;;  %v1668_v17 = vpop.eup %1667 }
 0x55b   : > { %760 = vrot.lane.b32.xlu1 %v2126_v13, %s1866_s24  ;;  %1110 = vadd.xlane.f32.xlu0 %v1109_v14  ;;  %v755_v18 = vsel %vm496_vm3, %v1668_v17, 0.0  ;;  %s2219_s24 = scalar_lea.hbm %s2276_s7, %s1453_s9 }
 0x571   : > { %937 = vrot.lane.b32.xlu0 %v2126_v13, %s1867_s12  ;;  %s1284_s12 = scalar_lea.sflag [#allocation6], %s2098_s21 }
 0x57f   : > { %756 = vadd.xlane.f32.xlu1 %v755_v18 }
 0x590   : > { %1114 = vrot.lane.b32.xlu1 %v2126_v13, %s1868_s23  ;;  %s1765_s23 = sshll.u32 %s1872_s17, 4  ;;  %s1766_s23 = int_to_ptr.vmem [resolvable:$false] %s1765_s23 }
 0x591   : > { %p1768_p5 = scmp.lt.s32.totalorder %s2221_s13, %s1766_s23 }
 0x5d7   : > { %v934_v19 = vpop.xlane.xlu1 %933 }
 0x5db   : > { %v761_v20 = vpop.permute.xlu1 %760 }
 0x5dc   : > { %1509 = vmatpush3.msra.mxu1 %v761_v20 }
 0x5dd   : > { %1518 = vmatprep.subr.mxu1 %v1856_v1 }
 0x5e8   : > { %v1111_v22 = vpop.xlane.xlu0 %1110 }
 0x5ec   : > { %v938_v26 = vpop.permute.xlu0 %937 }
 0x60c   : > { %v757_v21 = vpop.xlane.xlu1 %756 }
 0x60d   : > { %1669 = vrcp.f32 %v757_v21 }
 0x60e   : > { %1671 = vrcp.f32 %v934_v19 }
 0x60f   : > { %1673 = vrcp.f32 %v1111_v22 }
 0x610   : > { %v1115_v28 = vpop.permute.xlu1 %1114 }
 0x617   : > { %v1670_v23 = vpop.eup %1669 }
 0x618   : > { %v759_v24 = vmul.f32 %v1670_v23, %v1668_v17  ;;  %v1672_v25 = vpop.eup %1671 }
 0x619   : > { %v936_v13 = vmul.f32 %v1672_v25, %v1664_v7  ;;  %v1674_v27 = vpop.eup %1673 }
 0x61a   : > { %1511 = vmatmul.mubr.msk.f32.vlgmr.msra.gmra.mrb[6].mxu1 %vm496_vm3, %v759_v24  ;;  %v1113_v29 = vmul.f32 %v1674_v27, %v1666_v12 }
 0x61b   : > { %1519 = vmatpush3.msra.mxu1 %v938_v26  ;;  %1520 = vmatprep.mubr.msk.f32.mxu1 %vm1855_vm0, %v1856_v1 }
 0x61c   : > { %1528 = vmatprep.subr.mxu1 %v1856_v1 }
 0x61e   : > { %1521 = vmatmul.mubr.msk.f32.vlgmr.msra.gmra.mrb[8].mxu1 %vm496_vm3, %v936_v13 }
 0x61f   : > { %1529 = vmatpush3.msra.mxu1 %v1115_v28  ;;  %1530 = vmatprep.mubr.msk.f32.mxu1 %vm1855_vm0, %v1856_v1 }
 0x622   : > { %1531 = vmatmul.mubr.msk.f32.vlgmr.msra.gmra.mrb[10].mxu1 %vm496_vm3, %v1113_v29 }
 0x6ed   : > { %v832_v36 = vpop.f32.mrb[6].mxu1 }
 0x6ee   : > { %837 = vrot.lane.b32.xlu1 %v832_v36, %s1869_s10  ;;  %v1512_v37 = vpop.f32.mrb[7].mxu1  ;;  %s1767_s10 = scalar_lea.vmem %s1766_s23, 256 }
 0x6ef   : > { %p1769_p9 = scmp.lt.s32.totalorder %s1767_s10, %s1761_s27 }
 0x6f1   : > { %v1009_v38 = vpop.f32.mrb[8].mxu1  ;;  %p1770_p11 = por %p1769_p9, %p1768_p5 }
 0x6f2   : > { %1014 = vrot.lane.b32.xlu0 %v1009_v38, %s1870_s22  ;;  %v1522_v1 = vpop.f32.mrb[9].mxu1 }
 0x6f3   : > { %p1771_p0 = pnand %p1770_p11, %p1764_p3 }
 0x6f5   : > { %v1186_v39 = vpop.f32.mrb[10].mxu1 }
 0x6f6   : > { %1191 = vrot.lane.b32.xlu1 %v1186_v39, %s1871_s18  ;;  %v1532_v40 = vpop.f32.mrb[11].mxu1 }
 0x760   : > { %v838_v41 = vpop.permute.xlu1 %837 }
 0x761   : > { %841 = vst.msk [vmem:[#allocation3] sm:$0xff] %vm840_vm12, %v838_v41 }
 0x764   : > { %v1015_v0 = vpop.permute.xlu0 %1014 }
 0x765   : > { %1018 = vst.msk [vmem:[#allocation3] sm:$0xff] %vm1017_vm13, %v1015_v0 }
 0x768   : > { %v1192_v42 = vpop.permute.xlu1 %1191 }
 0x769   : > { %1195 = vst.msk [vmem:[#allocation3] sm:$0xff] %vm1194_vm14, %v1192_v42 }
 0x770   : > { %v1196_v43 = vld [vmem:[#allocation3] sm:$0xff] }
 0x771   : > { %1542 = vmatmul.mubr.msk.f32.vlgmr.msra.gmra.mrb[6].mxu0 %vm397_vm1, %v1196_v43 }
 0x844   : > { %v1278_v45 = vpop.f32.mrb[6].mxu0 }
 0x845   : > { %v1279_v46 = vadd.f32 %v1450_v44, %v1278_v45  ;;  %v1543_v47 = vpop.f32.mrb[7].mxu0 }
 0x847   : > { %1282 = vst.msk [vmem:[%s368_s11] sm:$0xff] %vm397_vm1, %v1279_v46 }
 0x848   : > { %1774 = shalt.err (!%p1771_p0)
}
 0x849   : > { %s1775_s21 = scalar_lea.hbm %s2219_s24, 128  ;;  %s1779_s30 = scalar_lea.hbm %s2276_s7, 256 }
 0x84a   : > { %p1776_p4 = scmp.ne.s32.totalorder %s2219_s24, %s1775_s21  ;;  %p1780_p7 = scmp.lt.u32.totalorder %s2219_s24, %s2276_s7 }
 0x84b   : > { %p1781_p2 = scmp.lt.u32.totalorder %s1779_s30, %s1775_s21  ;;  %p1783_p12 = scmp.lt.u32.totalorder %s1775_s21, %s2219_s24 }
 0x84c   : > { %p1777_p13 = pnand %p1776_p4, %p2297_p1 }
 0x84d   : > { %p1782_p8 = por %p1781_p2, %p1780_p7 }
 0x84e   : > { %p1778_p6 = pneg %p1777_p13 }
 0x84f   : > { %p1784_p10 = por %p1783_p12, %p1782_p8 }
 0x851   : > { %p1785_p3 = pnand %p1784_p10, %p1778_p6 }
 0x853   : > { %1788 = shalt.err (!%p1785_p3)
}
 0x854   : > { %1566 = dma.vmem_to_hbm [thread:$0]  (%p2297_p1), %s2221_s13, 128, %s2219_s24, %s1284_s12  }
 0x855 PF: > { %s2298_s11 = sld [smem:[#allocation14_spill]]  ;;  %s2299_s14 = sld [smem:[#allocation15_spill]] }
 0x856   : > { %p2301_p9 = scmp.ge.s32.totalorder %s1847_s29, 2 }
 0x85b   : > { %s1310_s15 = sand.u32 1, %s2298_s11   ;;  %p2300_p5 = scmp.ne.s32.totalorder %s2299_s14, 0 }
 0x85c   : > { %s1311_s27 = scalar_lea.sflag [#allocation6], %s1310_s15 }
 0x85d   : > { %p1580_p11 = pnand %p2301_p9, %p2300_p5 }
 0x85f   : > { %1822 = dma.done.wait (!%p1580_p11), %s1311_s27, 128  }
 0x860   : > { %1824 = vsyncadd (!%p1580_p11), %s1311_s27, 4294967168  ;;  %s24_s29 = sadd.s32 1, %s1847_s29   ;;  %s2302_s24 = smov %s1831_s25 }
 0x861   : > { %p21_p0 = scmp.ge.s32.totalorder %s24_s29, 4   ;;  %s2303_s25 = smov %s1835_s26 }
 0x862   : > { %s2304_s26 = smov %s2055_s19  ;;  %s2305_s27 = smov %s1843_s28 }
 0x863   : > { %s2306_s28 = smov %s2308_s20  ;;  %23 = sbr.rel (!%p21_p0) target bundleno = 7 (0x7), region = 112 }
 0x86a   :  { %1316 = vsyncpa [#allocation5], 1 }
 0x86b   :  { %1318 = vsyncpa [#allocation5 + $0x1], 1 }
 0x86c   :  { %1319 = vsyncpa [#allocation8], 1 }
 0x86d   :  { %1320 = vsyncpa [#allocation6], 1 }
 0x86e   :  { %1322 = vsyncpa [#allocation6 + $0x1], 1 }

</bundles_post_ra>
